<compile_context>
chip_gen: v7x
topology: tpu7x:2x2x1
jax: 0.10.0
libtpu: 0.0.40
codegen_flags: <defaults>
</compile_context>

<pallas_src>
import functools

import jax
import jax.numpy as jnp
import numpy as np
from jax.experimental import pallas as pl
from jax.experimental.pallas import tpu as pltpu


def _int_pow(x, g):
    """x**g for small non-negative integer g via square-and-multiply (VPU only)."""
    g = int(g)
    if g == 0:
        return jnp.ones_like(x)
    result = None
    base = x
    while g:
        if g & 1:
            result = base if result is None else result * base
        g >>= 1
        if g:
            base = base * base
    return result


def _es_loss_kernel(logits_ref, targets_ref, weights_ref, out_ref, *,
                    num_cls, focal, focal_gamma):
    """Per-tile class-balanced (focal) cross-entropy partial sums.

    logits_ref : (C, TS, 128) native float dtype (class-major, lane-dense)
    targets_ref: (TS, 128) int32, padded entries = -1
    weights_ref: (C,) float32 in SMEM
    out_ref    : (1, 8, 128) float32 partial-sum block, resident across the
                 inner (reduction) grid axis; one block per outer program.
    """
    i = pl.program_id(1)

    @pl.when(i == 0)
    def _init():
        out_ref[...] = jnp.zeros_like(out_ref)

    tgt = targets_ref[...]                                        # (TS, 128) i32

    # Per-class rows; cast to f32 only after the VMEM load (bf16 over HBM ok).
    rows = [logits_ref[c].astype(jnp.float32) for c in range(num_cls)]

    # Unrolled log-softmax over the (tiny) class dim: pure VPU/EUP, no XLU.
    m = rows[0]
    for c in range(1, num_cls):
        m = jnp.maximum(m, rows[c])
    exps = [jnp.exp(r - m) for r in rows]
    s = exps[0]
    for c in range(1, num_cls):
        s = s + exps[c]
    lse = jnp.log(s)

    # Gather log p_t, exp(x_t - m) and per-sample class weight via selects.
    log_pt = jnp.zeros_like(m)
    sel_exp = jnp.zeros_like(m)
    wt = jnp.zeros_like(m)
    for c in range(num_cls):
        sel = tgt == c
        log_pt = jnp.where(sel, rows[c] - m - lse, log_pt)
        sel_exp = jnp.where(sel, exps[c], sel_exp)
        wt = jnp.where(sel, weights_ref[c], wt)                   # scalar SMEM read

    ce = -log_pt                                                  # NLL, per sample

    if focal:
        pt = sel_exp / s                  # reuse computed exps; no fresh EUP exp
        omp = 1.0 - pt
        g = float(focal_gamma)
        if g.is_integer() and 0 <= int(g) <= 16:
            ft = _int_pow(omp, int(g))                            # square & multiply
        else:
            ft = jnp.where(omp > 0, jnp.maximum(omp, 0.0) ** g, 0.0)
        loss = ft * ce                    # focal_alpha folded into final scale
    else:
        loss = ce

    # Padded entries (tgt == -1) match no class select -> wt == 0, log_pt == 0,
    # sel_exp == 0 -> contribution is exactly 0 (all math stays finite).
    contrib = wt * loss                                           # (TS, 128)
    ts = contrib.shape[0]
    folded = jnp.sum(contrib.reshape(ts // 8, 8, 128), axis=0)    # (8,128) VPU adds
    out_ref[...] += folded[None, :, :]


def _round_up(a, b):
    return (a + b - 1) // b * b


def effective_samples_loss(inputs, targets, *, beta=0.9, num_cls=2,
                           sample_per_cls=None, focal=None,
                           focal_gamma=2.0, focal_alpha=1.0,
                           tile_rows=1024, num_cores=2):
    """inputs: (N, C) float logits (any float dtype); targets: (N,) int."""
    n, c = inputs.shape
    assert c == num_cls

    # Class-balanced weights (matches the PyTorch __init__/forward math).
    sample_per_cls = np.asarray(sample_per_cls, dtype=np.float64)
    effective_num = 1.0 - np.power(beta, sample_per_cls)
    weights = (1.0 - beta) / effective_num
    weights = weights / weights.sum() * num_cls
    weights = jnp.asarray(weights, dtype=jnp.float32)             # (C,) -> SMEM

    # Lane-dense, class-major layout: (C, rows, 128); the sample axis is tiled
    # with TS rows (multiple of 8 sublanes), TS*128 samples per grid step.
    rows = pl.cdiv(n, 128)
    ts = min(int(tile_rows), _round_up(rows, 8))
    ts = max(8, _round_up(ts, 8))
    nt_total = _round_up(pl.cdiv(rows, ts), num_cores)
    nt = nt_total // num_cores                                    # tiles per core
    rows_pad = nt_total * ts
    n_pad = rows_pad * 128

    # TODO(synk): if the producer emitted logits class-major (C, N) directly,
    # this transpose+pad pass (one extra HBM read+write of the logits) goes away.
    logits_t = inputs.T                                           # (C, N), native dtype
    targets_i = targets.astype(jnp.int32)
    if n_pad != n:
        logits_t = jnp.pad(logits_t, ((0, 0), (0, n_pad - n)))
        targets_i = jnp.pad(targets_i, (0, n_pad - n), constant_values=-1)
    logits3 = logits_t.reshape(c, rows_pad, 128)
    targets2 = targets_i.reshape(rows_pad, 128)

    kernel = functools.partial(
        _es_loss_kernel, num_cls=int(c), focal=bool(focal),
        focal_gamma=float(focal_gamma))

    bytes_accessed = (n_pad * c * logits3.dtype.itemsize          # logits read
                      + n_pad * 4                                 # targets read
                      + c * 4 + num_cores * 8 * 128 * 4)          # weights + partials
    cost = pl.CostEstimate(flops=12 * n_pad * c,
                           transcendentals=n_pad * (c + 1),
                           bytes_accessed=bytes_accessed)

    partials = pl.pallas_call(
        kernel,
        out_shape=jax.ShapeDtypeStruct((num_cores, 8, 128), jnp.float32),
        grid=(num_cores, nt),
        in_specs=[
            pl.BlockSpec((c, ts, 128), lambda p, i: (0, p * nt + i, 0)),
            pl.BlockSpec((ts, 128), lambda p, i: (p * nt + i, 0)),
            pl.BlockSpec(memory_space=pltpu.SMEM),                # class weights
        ],
        out_specs=pl.BlockSpec((1, 8, 128), lambda p, i: (p, 0, 0)),
        compiler_params=pltpu.CompilerParams(
            dimension_semantics=("parallel", "arbitrary"),
            vmem_limit_bytes=32 * 1024 * 1024),
        cost_estimate=cost,
    )(logits3, targets2, weights)

    # Final scale (focal_alpha and 1/true-N folded here) over the tiny
    # (num_cores, 8, 128) partial-sum tensor.
    scale = (float(focal_alpha) if focal else 1.0) / float(n)
    return jnp.sum(partials) * scale


def _reference(inputs, targets, *, beta, num_cls, sample_per_cls,
               focal, focal_gamma, focal_alpha):
    sample_per_cls = np.asarray(sample_per_cls, dtype=np.float64)
    effective_num = 1.0 - np.power(beta, sample_per_cls)
    weights = (1.0 - beta) / effective_num
    weights = weights / weights.sum() * num_cls
    weights = jnp.asarray(weights, dtype=jnp.float32)

    log_p = jax.nn.log_softmax(inputs.astype(jnp.float32), axis=-1)
    log_pt = jnp.take_along_axis(log_p, targets[:, None], axis=-1)[:, 0]
    ce = -log_pt
    if focal:
        pt = jnp.exp(log_pt)
        loss = focal_alpha * (1.0 - pt) ** focal_gamma * ce
    else:
        loss = ce
    return jnp.mean(weights[targets] * loss)


if __name__ == "__main__":
    key = jax.random.PRNGKey(0)
    ok = True
    beta = 0.9

    def check(out, ref, atol=1e-5, rtol=1e-4):
        return bool(jnp.allclose(out, ref, atol=atol, rtol=rtol))

    # Case 1: tiny case, C=4, plain CE and focal (integer gamma).
    N1, C1 = 8, 4
    spc1 = [100, 50, 30, 20]
    k1, k2, key = jax.random.split(key, 3)
    x1 = jax.random.normal(k1, (N1, C1), dtype=jnp.float32)
    t1 = jax.random.randint(k2, (N1,), 0, C1, dtype=jnp.int32)
    for focal in (None, True):
        out = effective_samples_loss(x1, t1, beta=beta, num_cls=C1,
                                     sample_per_cls=spc1, focal=focal,
                                     focal_gamma=2.0, focal_alpha=1.0)
        out = jax.block_until_ready(out)
        ref = _reference(x1, t1, beta=beta, num_cls=C1, sample_per_cls=spc1,
                         focal=focal, focal_gamma=2.0, focal_alpha=1.0)
        ok = ok and check(out, ref)

    # Case 1b: bf16 logits over HBM (cast to f32 inside the kernel).
    out = effective_samples_loss(x1.astype(jnp.bfloat16), t1, beta=beta,
                                 num_cls=C1, sample_per_cls=spc1, focal=True,
                                 focal_gamma=2.0, focal_alpha=1.0)
    out = jax.block_until_ready(out)
    ref = _reference(x1.astype(jnp.bfloat16), t1, beta=beta, num_cls=C1,
                     sample_per_cls=spc1, focal=True, focal_gamma=2.0,
                     focal_alpha=1.0)
    ok = ok and check(out, ref, atol=1e-4, rtol=1e-3)

    # Case 2: C=2, ragged tail padding + non-integer gamma pow path.
    N2, C2 = 300, 2
    spc2 = [200, 40]
    k3, k4, key = jax.random.split(key, 3)
    x2 = jax.random.normal(k3, (N2, C2), dtype=jnp.float32)
    t2 = jax.random.randint(k4, (N2,), 0, C2, dtype=jnp.int32)
    for focal, gamma in ((None, 2.0), (True, 2.0), (True, 1.5)):
        out = effective_samples_loss(x2, t2, beta=beta, num_cls=C2,
                                     sample_per_cls=spc2, focal=focal,
                                     focal_gamma=gamma, focal_alpha=0.75)
        out = jax.block_until_ready(out)
        ref = _reference(x2, t2, beta=beta, num_cls=C2, sample_per_cls=spc2,
                         focal=focal, focal_gamma=gamma, focal_alpha=0.75)
        ok = ok and check(out, ref)

    # Case 3: multi-step reduction axis and both partial-output slots
    # (tile_rows=8 -> grid (2, 2) for N=3000).
    N3, C3 = 3000, 2
    k5, k6, key = jax.random.split(key, 3)
    x3 = jax.random.normal(k5, (N3, C3), dtype=jnp.float32)
    t3 = jax.random.randint(k6, (N3,), 0, C3, dtype=jnp.int32)
    out = effective_samples_loss(x3, t3, beta=beta, num_cls=C3,
                                 sample_per_cls=spc2, focal=True,
                                 focal_gamma=3.0, focal_alpha=0.5,
                                 tile_rows=8)
    out = jax.block_until_ready(out)
    ref = _reference(x3, t3, beta=beta, num_cls=C3, sample_per_cls=spc2,
                     focal=True, focal_gamma=3.0, focal_alpha=0.5)
    ok = ok and check(out, ref)

    if ok:
        print("KERNEL_OK")
</pallas_src>

<mosaic_0001>
module attributes {stable_mosaic.version = 11 : i64} {
  func.func @_es_loss_kernel(%arg0: i32, %arg1: i32, %arg2: memref<4x8x128xf32, #tpu.memory_space<vmem>>, %arg3: memref<8x128xi32, #tpu.memory_space<vmem>>, %arg4: memref<4xf32, #tpu.memory_space<smem>>, %arg5: memref<1x8x128xf32, #tpu.memory_space<vmem>>) attributes {dimension_semantics = [#tpu.dimension_semantics<parallel>, #tpu.dimension_semantics<arbitrary>], iteration_bounds = array<i64: 2, 1>, scalar_prefetch = 0 : i64, scratch_operands = 0 : i64, tpu.core_type = #tpu.core_type<tc>, window_params = [{transform_indices = @transform_0, window_bounds = array<i64: 4, 8, 128>}, {transform_indices = @transform_1, window_bounds = array<i64: 8, 128>}, {transform_indices = @transform_2, window_bounds = array<i64: 4>}, {transform_indices = @transform_3, window_bounds = array<i64: 1, 8, 128>}]} {
    %c0_i32 = arith.constant 0 : i32
    %0 = arith.cmpi eq, %arg1, %c0_i32 : i32
    %1 = arith.extui %0 : i1 to i32
    %c0_i32_0 = arith.constant 0 : i32
    %2 = arith.cmpi ne, %1, %c0_i32_0 : i32
    scf.if %2 {
      %cst_25 = arith.constant 0.000000e+00 : f32
      %70 = vector.broadcast %cst_25 : f32 to vector<1x8x128xf32>
      %c0_26 = arith.constant 0 : index
      %c0_27 = arith.constant 0 : index
      %c0_28 = arith.constant 0 : index
      %71 = vector.load %arg5[%c0_26, %c0_27, %c0_28] : memref<1x8x128xf32, #tpu.memory_space<vmem>>, vector<1x8x128xf32>
      tpu.vector_store %arg5[%c0_26, %c0_27, %c0_28], %70 {strides = array<i32>} : memref<1x8x128xf32, #tpu.memory_space<vmem>>, vector<1x8x128xf32>,
    } else {
    }
    %c0 = arith.constant 0 : index
    %c0_1 = arith.constant 0 : index
    %3 = vector.load %arg3[%c0, %c0_1] : memref<8x128xi32, #tpu.memory_space<vmem>>, vector<8x128xi32>
    %c0_2 = arith.constant 0 : index
    %c0_3 = arith.constant 0 : index
    %c0_4 = arith.constant 0 : index
    %4 = vector.load %arg2[%c0_2, %c0_3, %c0_4] : memref<4x8x128xf32, #tpu.memory_space<vmem>>, vector<1x8x128xf32>
    %5 = vector.shape_cast %4 : vector<1x8x128xf32> to vector<8x128xf32>
    %c1 = arith.constant 1 : index
    %c0_5 = arith.constant 0 : index
    %c0_6 = arith.constant 0 : index
    %6 = vector.load %arg2[%c1, %c0_5, %c0_6] : memref<4x8x128xf32, #tpu.memory_space<vmem>>, vector<1x8x128xf32>
    %7 = vector.shape_cast %6 : vector<1x8x128xf32> to vector<8x128xf32>
    %c2 = arith.constant 2 : index
    %c0_7 = arith.constant 0 : index
    %c0_8 = arith.constant 0 : index
    %8 = vector.load %arg2[%c2, %c0_7, %c0_8] : memref<4x8x128xf32, #tpu.memory_space<vmem>>, vector<1x8x128xf32>
    %9 = vector.shape_cast %8 : vector<1x8x128xf32> to vector<8x128xf32>
    %c3 = arith.constant 3 : index
    %c0_9 = arith.constant 0 : index
    %c0_10 = arith.constant 0 : index
    %10 = vector.load %arg2[%c3, %c0_9, %c0_10] : memref<4x8x128xf32, #tpu.memory_space<vmem>>, vector<1x8x128xf32>
    %11 = vector.shape_cast %10 : vector<1x8x128xf32> to vector<8x128xf32>
    %12 = arith.maximumf %5, %7 : vector<8x128xf32>
    %13 = arith.maximumf %12, %9 : vector<8x128xf32>
    %14 = arith.maximumf %13, %11 : vector<8x128xf32>
    %15 = arith.subf %5, %14 : vector<8x128xf32>
    %16 = math.exp %15 : vector<8x128xf32>
    %17 = arith.subf %7, %14 : vector<8x128xf32>
    %18 = math.exp %17 : vector<8x128xf32>
    %19 = arith.subf %9, %14 : vector<8x128xf32>
    %20 = math.exp %19 : vector<8x128xf32>
    %21 = arith.subf %11, %14 : vector<8x128xf32>
    %22 = math.exp %21 : vector<8x128xf32>
    %23 = arith.addf %16, %18 : vector<8x128xf32>
    %24 = arith.addf %23, %20 : vector<8x128xf32>
    %25 = arith.addf %24, %22 : vector<8x128xf32>
    %26 = math.log %25 : vector<8x128xf32>
    %cst = arith.constant 0.000000e+00 : f32
    %27 = vector.broadcast %cst : f32 to vector<8x128xf32>
    %cst_11 = arith.constant 0.000000e+00 : f32
    %28 = vector.broadcast %cst_11 : f32 to vector<8x128xf32>
    %c0_i32_12 = arith.constant 0 : i32
    %29 = vector.broadcast %c0_i32_12 : i32 to vector<8x128xi32>
    %30 = arith.cmpi eq, %3, %29 : vector<8x128xi32>
    %31 = arith.subf %5, %14 : vector<8x128xf32>
    %32 = arith.subf %31, %26 : vector<8x128xf32>
    %33 = arith.select %30, %32, %27 : vector<8x128xi1>, vector<8x128xf32>
    %c0_13 = arith.constant 0 : index
    %34 = memref.load %arg4[%c0_13] : memref<4xf32, #tpu.memory_space<smem>>
    %35 = vector.broadcast %34 : f32 to vector<8x128xf32>
    %36 = arith.select %30, %35, %28 : vector<8x128xi1>, vector<8x128xf32>
    %c1_i32 = arith.constant 1 : i32
    %37 = vector.broadcast %c1_i32 : i32 to vector<8x128xi32>
    %38 = arith.cmpi eq, %3, %37 : vector<8x128xi32>
    %39 = arith.subf %7, %14 : vector<8x128xf32>
    %40 = arith.subf %39, %26 : vector<8x128xf32>
    %41 = arith.select %38, %40, %33 : vector<8x128xi1>, vector<8x128xf32>
    %c1_14 = arith.constant 1 : index
    %42 = memref.load %arg4[%c1_14] : memref<4xf32, #tpu.memory_space<smem>>
    %43 = vector.broadcast %42 : f32 to vector<8x128xf32>
    %44 = arith.select %38, %43, %36 : vector<8x128xi1>, vector<8x128xf32>
    %c2_i32 = arith.constant 2 : i32
    %45 = vector.broadcast %c2_i32 : i32 to vector<8x128xi32>
    %46 = arith.cmpi eq, %3, %45 : vector<8x128xi32>
    %47 = arith.subf %9, %14 : vector<8x128xf32>
    %48 = arith.subf %47, %26 : vector<8x128xf32>
    %49 = arith.select %46, %48, %41 : vector<8x128xi1>, vector<8x128xf32>
    %c2_15 = arith.constant 2 : index
    %50 = memref.load %arg4[%c2_15] : memref<4xf32, #tpu.memory_space<smem>>
    %51 = vector.broadcast %50 : f32 to vector<8x128xf32>
    %52 = arith.select %46, %51, %44 : vector<8x128xi1>, vector<8x128xf32>
    %c3_i32 = arith.constant 3 : i32
    %53 = vector.broadcast %c3_i32 : i32 to vector<8x128xi32>
    %54 = arith.cmpi eq, %3, %53 : vector<8x128xi32>
    %55 = arith.subf %11, %14 : vector<8x128xf32>
    %56 = arith.subf %55, %26 : vector<8x128xf32>
    %57 = arith.select %54, %56, %49 : vector<8x128xi1>, vector<8x128xf32>
    %c3_16 = arith.constant 3 : index
    %58 = memref.load %arg4[%c3_16] : memref<4xf32, #tpu.memory_space<smem>>
    %59 = vector.broadcast %58 : f32 to vector<8x128xf32>
    %60 = arith.select %54, %59, %52 : vector<8x128xi1>, vector<8x128xf32>
    %cst_17 = arith.constant 0.000000e+00 : f32
    %61 = vector.broadcast %cst_17 : f32 to vector<8x128xf32>
    %62 = arith.subf %61, %57 : vector<8x128xf32>
    %63 = arith.mulf %60, %62 : vector<8x128xf32>
    %64 = vector.shape_cast %63 : vector<8x128xf32> to vector<1x8x128xf32>
    %cst_18 = arith.constant dense<0.000000e+00> : vector<8x128xf32>
    %65 = vector.multi_reduction <add>, %64, %cst_18 [0] : vector<1x8x128xf32> to vector<8x128xf32>
    %c0_19 = arith.constant 0 : index
    %c0_20 = arith.constant 0 : index
    %c0_21 = arith.constant 0 : index
    %66 = vector.load %arg5[%c0_19, %c0_20, %c0_21] : memref<1x8x128xf32, #tpu.memory_space<vmem>>, vector<1x8x128xf32>
    %67 = vector.shape_cast %65 : vector<8x128xf32> to vector<1x8x128xf32>
    %68 = arith.addf %66, %67 : vector<1x8x128xf32>
    %c0_22 = arith.constant 0 : index
    %c0_23 = arith.constant 0 : index
    %c0_24 = arith.constant 0 : index
    %69 = vector.load %arg5[%c0_22, %c0_23, %c0_24] : memref<1x8x128xf32, #tpu.memory_space<vmem>>, vector<1x8x128xf32>
    tpu.vector_store %arg5[%c0_22, %c0_23, %c0_24], %68 {strides = array<i32>} : memref<1x8x128xf32, #tpu.memory_space<vmem>>, vector<1x8x128xf32>,
    return
  }
  func.func @transform_0(%arg0: i32, %arg1: i32) -> (i32, i32, i32) {
    %c1_i32 = arith.constant 1 : i32
    %0 = arith.muli %arg0, %c1_i32 : i32
    %1 = arith.addi %0, %arg1 : i32
    %c0_i32 = arith.constant 0 : i32
    %c0_i32_0 = arith.constant 0 : i32
    %c0_i32_1 = arith.constant 0 : i32
    return %c0_i32, %1, %c0_i32_0 : i32, i32, i32
  }
  func.func @transform_1(%arg0: i32, %arg1: i32) -> (i32, i32) {
    %c1_i32 = arith.constant 1 : i32
    %0 = arith.muli %arg0, %c1_i32 : i32
    %1 = arith.addi %0, %arg1 : i32
    %c0_i32 = arith.constant 0 : i32
    %c0_i32_0 = arith.constant 0 : i32
    return %1, %c0_i32 : i32, i32
  }
  func.func @transform_2(%arg0: i32, %arg1: i32) -> i32 {
    %c0_i32 = arith.constant 0 : i32
    %c0_i32_0 = arith.constant 0 : i32
    return %c0_i32 : i32
  }
  func.func @transform_3(%arg0: i32, %arg1: i32) -> (i32, i32, i32) {
    %c0_i32 = arith.constant 0 : i32
    %c0_i32_0 = arith.constant 0 : i32
    %c0_i32_1 = arith.constant 0 : i32
    return %arg0, %c0_i32, %c0_i32_0 : i32, i32, i32
  }
}

</mosaic_0001>

<bundles_post_ra>
// kernel: tpu_custom_call.1
= control target key start
LH: loop header
LB: loop body
LE: loop exit
PB: predicated region body
PF: predicated region fallthrough
CT: control target
= control target key end

     0   :  { %s1017_s0 = inlined_call_operand.hbm [shape: f32[4,16,128], index: 0, kind: input, shape index: {}]   ;;  %s1018_s1 = inlined_call_operand.hbm [shape: s32[16,128], index: 1, kind: input, shape index: {}]   ;;  %s1019_s2 = inlined_call_operand.vmem [shape: f32[4], index: 2, kind: input, shape index: {}]   ;;  %s1020_s3 = inlined_call_operand.hbm [shape: f32[2,8,128], index: 3, kind: output, shape index: {}]  }
   0x1   :  { %1027 = sst [smem:[#allocation15_spill]] %s1017_s0 }
   0x2   :  { %1028 = sst [smem:[#allocation16_spill]] %s1019_s2 }
   0x3   :  { %8 = vsyncpa [#allocation3], 0 }
   0x4   :  { %10 = vsyncpa [#allocation3 + $0x1], 0 }
   0x5   :  { %11 = vsyncpa [#allocation7], 0 }
   0x6   :  { %13 = vsyncpa [#allocation7 + $0x1], 0 }
   0x7   :  { %14 = vsyncpa [#allocation5], 0 }
   0x8   :  { %15 = vsyncpa [#allocation4], 0 }
   0x9   :  { %17 = vsyncpa [#allocation4 + $0x1], 0  ;;  %s761_s12 = smov 0   ;;  %s763_s13 = smov 0  }
   0xa   :  { %s765_s14 = smov 0   ;;  %s767_s15 = smov 0  }
   0xb   :  { %s769_s16 = smov 0   ;;  %s771_s17 = smov 0  }
   0xc LB: > { %s451_s18 = sadd.s32 4294967295, %s732_s17   ;;  %s452_s19 = sadd.s32 4294967294, %s732_s17   ;;  %s732_s17 = sphi %s771_s17, %s23_s17   ;;  %s728_s16 = sphi %s769_s16, %s1052_s16   ;;  %s724_s15 = sphi %s767_s15, %s1051_s15   ;;  %s720_s14 = sphi %s765_s14, %s1050_s14   ;;  %s716_s13 = sphi %s763_s13, %s1049_s13   ;;  %s712_s12 = sphi %s761_s12, %s1048_s12  }
   0xd   : > { %s44_s20 = sadd.s32 1, %s720_s14  ;;  %p51_p0 = scmp.ne.s32.totalorder %s720_s14, %s716_s13 }
   0xe   : > { %p52_p1 = scmp.eq.s32.totalorder %s732_s17, 0  ;;  %p57_p2 = scmp.ne.s32.totalorder %s716_s13, %s712_s12 }
   0xf   : > { %p799_p3 = scmp.eq.s32.totalorder %s451_s18, 0  ;;  %p130_p4 = scmp.eq.s32.totalorder %s451_s18, 1 }
  0x10   : > { %p803_p5 = por %p52_p1, %p51_p0  ;;  %p136_p6 = scmp.eq.s32.totalorder %s452_s19, 1 }
  0x11   : > { %s1029_s21 = scalar_select %p799_p3, 1, 0 }
  0x12   : > { %p809_p7 = por %p799_p3, %p57_p2  ;;  %p813_p8 = por %p130_p4, %p51_p0 }
  0x13   : > { %p817_p9 = por %p136_p6, %p57_p2  ;;  %p453_p10 = scmp.ge.s32.totalorder %s732_s17, 1 }
  0x14   : > { %s1031_s23 = scalar_select %p809_p7, 1, 0 }
  0x15   : > { %s1032_s24 = scalar_select %p813_p8, 1, 0 }
  0x16   : > { %s1033_s25 = scalar_select %p817_p9, 1, 0 }
  0x17   : > { %p143_p11 = scmp.lt.s32.totalorder %s732_s17, 3  ;;  %s1034_s2 = sld [smem:[#allocation16_spill]] }
  0x18   : > { %p501_p0 = scmp.lt.s32.totalorder %s732_s17, 2  ;;  %s35_s5 = sadd.s32 1, %s728_s16 }
  0x19   : > { %p826_p12 = pnand %p453_p10, %p143_p11  ;;  %p847_p6 = scmp.ge.s32.totalorder %s35_s5, 2 }
  0x1a   : > { %p836_p2 = pnand %p501_p0, %p803_p5  ;;  %s852_s7 = sand.u32 1, %s720_s14  }
  0x1b   : > { %s1035_s29 = scalar_select %p826_p12, 1, 0 }
  0x1c   : > { %p485_p1 = pneg %p826_p12 }
  0x1d   : > { %s156_s28 = sshll.u32 %s1034_s2, 4  ;;  %s157_s28 = int_to_ptr.vmem [resolvable:$true] %s156_s28 }
  0x1e   : > { %p842_p4 = pnand %p485_p1, %p799_p3  ;;  %s567_s8 = scalar_lea.vmem %s157_s28, 16 }
  0x1f   : > { %p568_p10 = scmp.ne.s32.totalorder %s157_s28, %s567_s8  ;;  %p575_p13 = scmp.lt.s32.totalorder %s157_s28, %s157_s28 }
  0x20   : > { %p569_p5 = pneg %p842_p4  ;;  %p576_p9 = scmp.lt.s32.totalorder %s567_s8, %s567_s8 }
  0x22   : > { %p570_p11 = pnand %p569_p5, %p568_p10  ;;  %p577_p1 = por %p576_p9, %p575_p13 }
  0x24   : > { %p571_p0 = pneg %p570_p11 }
  0x26   : > { %p578_p8 = pnand %p577_p1, %p571_p0 }
  0x28   : > { %581 = shalt.err (!%p578_p8)
}
  0x29   : > { %s734_s9 = smov [#allocation8]   ;;  %s1054_s5 = smov (%p847_p6, %s35_s5), 0 }
  0x2a   : > { %488 = dma.vmem_to_smem (!%p842_p4), %s157_s28, 16, %s734_s9, [#allocation5]  }
  0x2b   : > { %1039 = sst [smem:[#allocation14_spill]] %s1054_s5  ;;  %s456_s10 = sshll.u32 %s852_s7, 5 }
  0x2c   : > { %s41_s11 = ssub.s32 %s728_s16, %s1054_s5  ;;  %s457_s18 = sshll.u32 %s728_s16, 7 }
  0x2d   : > { %p42_p8 = scmp.eq.s32.totalorder %s41_s11, 0  ;;  %s1040_s0 = sld [smem:[#allocation15_spill]] }
  0x2e   : > { %s171_s27 = scalar_lea.vmem [#allocation2], %s456_s10  ;;  %s168_s6 = scalar_lea.sflag [#allocation3], %s852_s7 }
  0x2f   : > { %s178_s28 = sshll.u32 %s171_s27, 4  ;;  %p584_p13 = pneg %p836_p2  ;;  %s878_s28 = int_to_ptr.vmem [resolvable:$true] %s178_s28 }
  0x30   : > { %s876_s4 = scalar_select %p42_p8, %s720_s14, %s44_s20  }
  0x33   : > { %s871_s26 = scalar_lea.hbm %s1040_s0, %s457_s18  ;;  %s587_s19 = scalar_lea.hbm %s1040_s0, 1024 }
  0x34   : > { %s582_s8 = scalar_lea.hbm %s871_s26, 512  ;;  %p588_p10 = scmp.lt.u32.totalorder %s871_s26, %s1040_s0 }
  0x35   : > { %p583_p9 = scmp.ne.s32.totalorder %s871_s26, %s582_s8  ;;  %p589_p5 = scmp.lt.u32.totalorder %s587_s19, %s582_s8 }
  0x36   : > { %p591_p0 = scmp.lt.u32.totalorder %s582_s8, %s871_s26 }
  0x37   : > { %p585_p4 = pnand %p584_p13, %p583_p9  ;;  %p590_p11 = por %p589_p5, %p588_p10 }
  0x39   : > { %p586_p6 = pneg %p585_p4  ;;  %p592_p1 = por %p591_p0, %p590_p11 }
  0x3b   : > { %p593_p8 = pnand %p592_p1, %p586_p6 }
  0x3d   : > { %596 = shalt.err (!%p593_p8)
}
  0x3e   : > { %s597_s20 = scalar_lea.vmem %s878_s28, 512  ;;  %s735_s27 = smov [#allocation2]  }
  0x3f   : > { %p598_p9 = scmp.ne.s32.totalorder %s878_s28, %s597_s20  ;;  %s602_s9 = sshll.u32 %s735_s27, 4  ;;  %s603_s9 = int_to_ptr.vmem [resolvable:$false] %s602_s9 }
  0x40   : > { %s604_s11 = scalar_lea.vmem %s603_s9, 1024  ;;  %p605_p7 = scmp.lt.s32.totalorder %s878_s28, %s603_s9 }
  0x41   : > { %p600_p4 = pnand %p598_p9, %p584_p13  ;;  %p606_p10 = scmp.lt.s32.totalorder %s604_s11, %s597_s20 }
  0x43   : > { %p601_p3 = pneg %p600_p4  ;;  %p607_p5 = por %p606_p10, %p605_p7 }
  0x45   : > { %p608_p11 = pnand %p607_p5, %p601_p3 }
  0x47   : > { %611 = shalt.err (!%p608_p11)
}
  0x48   : > { %s736_s8 = smov 256   ;;  %s737_s19 = smov 128  }
  0x49   : > { %s738_s10 = smov 8   ;;  %s458_s22 = sshll.u32 %s852_s7, 3 }
  0x4a   : > { %492 = dma.hbm_to_vmem [thread:$0]  (!%p836_p2), %s871_s26, 512, %s878_s28, %s168_s6, %s736_s8, %s737_s19, %s738_s10  }
  0x4b   : > { %s914_s9 = scalar_lea.hbm %s1018_s1, %s457_s18  ;;  %s192_s11 = scalar_lea.vmem [#allocation6], %s458_s22 }
  0x4c   : > { %s200_s0 = sshll.u32 %s192_s11, 4  ;;  %s189_s2 = scalar_lea.sflag [#allocation7], %s852_s7  ;;  %s201_s0 = int_to_ptr.vmem [resolvable:$true] %s200_s0 }
  0x4d   : > { %s612_s5 = scalar_lea.hbm %s914_s9, 128  ;;  %s617_s6 = scalar_lea.hbm %s1018_s1, 256 }
  0x4e   : > { %p613_p3 = scmp.ne.s32.totalorder %s914_s9, %s612_s5  ;;  %p618_p0 = scmp.lt.u32.totalorder %s914_s9, %s1018_s1 }
  0x4f   : > { %p619_p1 = scmp.lt.u32.totalorder %s617_s6, %s612_s5  ;;  %p621_p9 = scmp.lt.u32.totalorder %s612_s5, %s914_s9 }
  0x50   : > { %p615_p7 = pnand %p613_p3, %p584_p13 }
  0x51   : > { %p620_p8 = por %p619_p1, %p618_p0 }
  0x52   : > { %p616_p6 = pneg %p615_p7 }
  0x53   : > { %p622_p4 = por %p621_p9, %p620_p8 }
  0x55   : > { %p623_p10 = pnand %p622_p4, %p616_p6 }
  0x57   : > { %626 = shalt.err (!%p623_p10)
}
  0x58   : > { %s627_s7 = scalar_lea.vmem %s201_s0, 128  ;;  %s739_s19 = smov [#allocation6]  }
  0x59   : > { %p628_p5 = scmp.ne.s32.totalorder %s201_s0, %s627_s7  ;;  %s632_s10 = sshll.u32 %s739_s19, 4  ;;  %s633_s10 = int_to_ptr.vmem [resolvable:$false] %s632_s10 }
  0x5a   : > { %s634_s22 = scalar_lea.vmem %s633_s10, 256  ;;  %p635_p7 = scmp.lt.s32.totalorder %s201_s0, %s633_s10 }
  0x5b   : > { %p630_p11 = pnand %p628_p5, %p584_p13  ;;  %p636_p12 = scmp.lt.s32.totalorder %s634_s22, %s627_s7 }
  0x5d   : > { %p631_p3 = pneg %p630_p11  ;;  %p637_p0 = por %p636_p12, %p635_p7 }
  0x5f   : > { %p638_p1 = pnand %p637_p0, %p631_p3 }
  0x61   : > { %641 = shalt.err (!%p638_p1)
}
  0x62   : > { %495 = dma.hbm_to_vmem [thread:$0]  (!%p836_p2), %s914_s9, 128, %s201_s0, %s189_s2  }
  0x63   : > { %p1041_p6 = scmp.ne.s32.totalorder %s1035_s29, 0 }
  0x64   : > { %s939_s5 = sand.u32 (!%p1041_p6), 1, %s716_s13   ;;  %p1042_p13 = scmp.ne.s32.totalorder (!%p1041_p6), %s1031_s23, 0 }
  0x65   : > { %209 = sbr.rel (%p1041_p6) target bundleno = 183 (0xb7), region = 32  ;;  %s461_s20 = sshll.u32 (!%p1041_p6), %s939_s5, 5 }
  0x66   : > { %s212_s27 = scalar_lea.sflag (!%p1041_p6), [#allocation3], %s939_s5  ;;  %s215_s11 = scalar_lea.vmem (!%p1041_p6), [#allocation2], %s461_s20 }
  0x6c   : > { %695 = dma.done.wait (%p1042_p13), %s212_s27, 512  }
  0x6d   : > { %697 = vsyncadd (%p1042_p13), %s212_s27, 4294966784  ;;  %s462_s0 = sshll.u32 %s939_s5, 3  ;;  %s221_s2 = scalar_lea.sflag [#allocation7], %s939_s5 }
  0x6e   : > { %s951_s29 = scalar_lea.vmem [#allocation6], %s462_s0 }
  0x6f   : > { %699 = dma.done.wait (%p1042_p13), %s221_s2, 128  }
  0x70   : > { %701 = vsyncadd (%p1042_p13), %s221_s2, 4294967168  ;;  %p1043_p12 = scmp.ne.s32.totalorder %s1029_s21, 0 }
  0x72   : > { %703 = dma.done.wait (%p1043_p12), [#allocation5], 16  }
  0x73   : > { %705 = vsyncadd (%p1043_p12), [#allocation5], 4294967280 }
  0x74   : > { %233 = sfence }
  0x75   : > { %v265_v0 = vld [vmem:[%s215_s11] sm:$0xff]  ;;  %v465_v1 = vld [vmem:[%s215_s11 + $0x8] sm:$0xff]  ;;  %v466_v2 = vld [vmem:[%s215_s11 + $0x10] sm:$0xff]  ;;  %s295_s21 = sld [smem:[#allocation8]]  ;;  %s468_s23 = sld [smem:[#allocation8 + $0x1]] }
  0x76   : > { %v272_v3 = vmax.f32 %v265_v0, %v465_v1  ;;  %v467_v4 = vld [vmem:[%s215_s11 + $0x18] sm:$0xff]  ;;  %s469_s30 = sld [smem:[#allocation8 + $0x2]]  ;;  %v264_v22 = vld [vmem:[%s951_s29] sm:$0xff]  ;;  %s470_s9 = sld [smem:[#allocation8 + $0x3]] }
  0x77   : > { %vm292_vm0 = vcmp.eq.s32.totalorder %v264_v22, 0  ;;  %vm298_vm1 = vcmp.eq.s32.totalorder %v264_v22, 1  ;;  %vm304_vm2 = vcmp.eq.s32.totalorder %v264_v22, 2  ;;  %vm310_vm3 = vcmp.eq.s32.totalorder %v264_v22, 3  ;;  %s472_s26 = sshll.u32 %s724_s15, 7  ;;  %s256_s28 = scalar_lea.vmem [#allocation9], %s462_s0 }
  0x78   : > { %v273_v5 = vmax.f32 %v272_v3, %v466_v2  ;;  %s336_s6 = sshll.u32 %s256_s28, 4  ;;  %s968_s7 = scalar_lea.hbm %s1020_s3, %s472_s26  ;;  %s970_s6 = int_to_ptr.vmem [resolvable:$true] %s336_s6 }
  0x79   : > { %s323_s19 = scalar_lea.sflag [#allocation4], %s939_s5  ;;  %s642_s10 = scalar_lea.vmem %s970_s6, 128 }
  0x7a   : > { %v274_v6 = vmax.f32 %v273_v5, %v467_v4  ;;  %p643_p2 = scmp.ne.s32.totalorder %s970_s6, %s642_s10  ;;  %p1044_p8 = scmp.ne.s32.totalorder %s1032_s24, 0 }
  0x7b   : > { %v296_v23 = vstv %s295_s21  ;;  %v302_v25 = vstv %s468_s23  ;;  %s740_s15 = smov [#allocation9]  }
  0x7c   : > { %v275_v7 = vsub.f32 %v265_v0, %v274_v6  ;;  %v278_v8 = vsub.f32 %v465_v1, %v274_v6  ;;  %v281_v9 = vsub.f32 %v466_v2, %v274_v6  ;;  %v284_v10 = vsub.f32 %v467_v4, %v274_v6  ;;  %p644_p9 = pnand %p643_p2, %p1044_p8  ;;  %s646_s22 = sshll.u32 %s740_s15, 4  ;;  %s647_s22 = int_to_ptr.vmem [resolvable:$false] %s646_s22 }
  0x7d   : > { %v297_v24 = vsel %vm292_vm0, %v296_v23, 0.0  ;;  %v308_v29 = vstv %s469_s30  ;;  %v314_v36 = vstv %s470_s9  ;;  %s648_s20 = scalar_lea.vmem %s647_s22, 256  ;;  %p649_p10 = scmp.lt.s32.totalorder %s970_s6, %s647_s22 }
  0x7e   : > { %v276_v11 = vmul.f32 1.442695, %v275_v7  ;;  %v279_v12 = vmul.f32 1.442695, %v278_v8  ;;  %v282_v13 = vmul.f32 1.442695, %v281_v9  ;;  %v303_v28 = vsel %vm298_vm1, %v302_v25, %v297_v24  ;;  %p645_p4 = pneg %p644_p9  ;;  %p650_p5 = scmp.lt.s32.totalorder %s648_s20, %s642_s10 }
  0x7f   : > { %v285_v14 = vmul.f32 1.442695, %v284_v10  ;;  %v309_v35 = vsel %vm304_vm2, %v308_v29, %v303_v28 }
  0x80   : > { %557 = vpow2.f32 %v276_v11  ;;  %v315_v40 = vsel %vm310_vm3, %v314_v36, %v309_v35  ;;  %p651_p11 = por %p650_p5, %p649_p10 }
  0x81   : > { %559 = vpow2.f32 %v279_v12 }
  0x82   : > { %561 = vpow2.f32 %v282_v13  ;;  %p652_p3 = pnand %p651_p11, %p645_p4 }
  0x83   : > { %563 = vpow2.f32 %v285_v14 }
  0x8a   : > { %v558_v15 = vpop.eup %557 }
  0x8b   : > { %v560_v16 = vpop.eup %559 }
  0x8c   : > { %v562_v17 = vpop.eup %561  ;;  %v287_v18 = vadd.f32 %v560_v16, %v558_v15 }
  0x8d   : > { %v564_v19 = vpop.eup %563 }
  0x8e   : > { %v288_v20 = vadd.f32 %v562_v17, %v287_v18 }
  0x90   : > { %v289_v21 = vadd.f32 %v564_v19, %v288_v20 }
  0x92   : > { %565 = vlog2.f32 %v289_v21 }
  0x9c   : > { %v566_v26 = vpop.eup %565 }
  0x9d   : > { %v291_v27 = vmul.f32 0.6931472, %v566_v26 }
  0x9f   : > { %v293_v30 = vsub.f32 %v275_v7, %v291_v27  ;;  %v299_v31 = vsub.f32 %v278_v8, %v291_v27  ;;  %v305_v32 = vsub.f32 %v281_v9, %v291_v27  ;;  %v311_v33 = vsub.f32 %v284_v10, %v291_v27 }
  0xa1   : > { %v294_v34 = vsel %vm292_vm0, %v293_v30, 0.0 }
  0xa2   : > { %v300_v37 = vsel %vm298_vm1, %v299_v31, %v294_v34 }
  0xa3   : > { %v306_v38 = vsel %vm304_vm2, %v305_v32, %v300_v37 }
  0xa4   : > { %v312_v39 = vsel %vm310_vm3, %v311_v33, %v306_v38 }
  0xa5   : > { %v316_v41 = vsub.f32 0.0, %v312_v39 }
  0xa7   : > { %v317_v42 = vmul.f32 %v316_v41, %v315_v40 }
  0xa9   : > { %321 = vst [vmem:[%s256_s28] sm:$0xff] %v317_v42 }
  0xaa   : > { %655 = shalt.err (!%p652_p3)
}
  0xab   : > { %s656_s5 = scalar_lea.hbm %s968_s7, 128  ;;  %s660_s0 = scalar_lea.hbm %s1020_s3, 256 }
  0xac   : > { %p657_p7 = scmp.ne.s32.totalorder %s968_s7, %s656_s5  ;;  %p661_p6 = scmp.lt.u32.totalorder %s968_s7, %s1020_s3 }
  0xad   : > { %p662_p13 = scmp.lt.u32.totalorder %s660_s0, %s656_s5  ;;  %p664_p2 = scmp.lt.u32.totalorder %s656_s5, %s968_s7 }
  0xae   : > { %p658_p0 = pnand %p657_p7, %p1044_p8 }
  0xaf   : > { %p663_p12 = por %p662_p13, %p661_p6 }
  0xb0   : > { %p659_p1 = pneg %p658_p0 }
  0xb1   : > { %p665_p9 = por %p664_p2, %p663_p12 }
  0xb3   : > { %p666_p4 = pnand %p665_p9, %p659_p1 }
  0xb5   : > { %669 = shalt.err (!%p666_p4)
}
  0xb6   : > { %483 = dma.vmem_to_hbm [thread:$0]  (%p1044_p8), %s970_s6, 128, %s968_s7, %s323_s19  }
  0xb7 PF: > { %s348_s21 = sand.u32 1, %s712_s12   ;;  %p1045_p10 = scmp.ne.s32.totalorder %s1033_s25, 0 }
  0xb8   : > { %p1046_p5 = scmp.ge.s32.totalorder %s732_s17, 2  ;;  %s349_s23 = scalar_lea.sflag [#allocation4], %s348_s21 }
  0xba   : > { %p497_p11 = pnand %p1046_p5, %p1045_p10 }
  0xbc   : > { %707 = dma.done.wait (!%p497_p11), %s349_s23, 128  }
  0xbd   : > { %709 = vsyncadd (!%p497_p11), %s349_s23, 4294967168  ;;  %s23_s17 = sadd.s32 1, %s732_s17   ;;  %s1047_s24 = sld [smem:[#allocation14_spill]] }
  0xbe   : > { %p20_p3 = scmp.ge.s32.totalorder %s23_s17, 4   ;;  %s1048_s12 = smov %s716_s13 }
  0xbf   : > { %s1049_s13 = smov %s720_s14  ;;  %s1050_s14 = smov %s876_s4 }
  0xc0   : > { %s1051_s15 = smov %s728_s16  ;;  %22 = sbr.rel (!%p20_p3) target bundleno = 12 (0xc), region = 102 }
  0xc3   : > { %s1052_s16 = smov %s1047_s24 }
  0xc7   :  { %354 = vsyncpa [#allocation3], 1 }
  0xc8   :  { %356 = vsyncpa [#allocation3 + $0x1], 1 }
  0xc9   :  { %357 = vsyncpa [#allocation7], 1 }
  0xca   :  { %359 = vsyncpa [#allocation7 + $0x1], 1 }
  0xcb   :  { %360 = vsyncpa [#allocation4], 1 }
  0xcc   :  { %362 = vsyncpa [#allocation4 + $0x1], 1 }
  0xcd   :  { %363 = vsyncpa [#allocation5], 1 }
  0xce   :  { %365 = vsyncpa [#allocation5 + $0x1], 1 }

</bundles_post_ra>
